<compile_context>
chip_gen: v7x
topology: tpu7x:2x2x1
jax: 0.10.0
libtpu: 0.0.40
codegen_flags: <defaults>
</compile_context>

<pallas_src>
import jax
import jax.numpy as jnp
from jax.experimental import pallas as pl
from jax.experimental.pallas import tpu as pltpu


def _senet_kernel(x_ref, w1_ref, w2_ref, o_ref):
    x = x_ref[...]                                                    # (TB, F*E)

    # Excitation: two tiny matmuls on VMEM-resident folded weights.  The mean
    # squeeze lives inside w1_eff; the per-field gate broadcast inside w2_eff.
    a = jnp.maximum(
        jnp.dot(x, w1_ref[...], preferred_element_type=jnp.float32), 0.0)      # (TB, R)
    gate = jnp.maximum(
        jnp.dot(a, w2_ref[...], preferred_element_type=jnp.float32), 0.0)      # (TB, F*E)

    # Re-weight: single fused, lane-dense, unmasked store (HBM-bound path).
    o_ref[...] = (x * gate.astype(x.dtype)).astype(o_ref.dtype)


def _pick_vmem_limit_bytes():
    # ~75% of physical VMEM leaves headroom for compiler scratch / semaphores:
    # 48 MiB on v7x (64 MiB parts), 96 MiB on v5e/v6e (128 MiB parts).
    try:
        cap = getattr(pltpu.get_tpu_info(), "vmem_capacity_bytes", None)
    except Exception:
        cap = None
    if not cap:
        return 48 << 20          # safe on every generation (v7x physical = 64 MiB)
    return min(int(cap) * 3 // 4, 112 << 20)


def _choose_block_b(B, FE, itemsize, vmem_limit, block_b):
    if block_b is None:
        # Four big pipelined buffers: (in + out) x double-buffered.  The lane-
        # dense (block_b, F*E) layout makes the padded tile size == F*E*itemsize
        # per row (no (8,128) inflation), so this arithmetic is exact.
        budget = int(vmem_limit * 0.7)
        per_row = FE * itemsize * 2 * 2
        block_b = max(8, budget // max(1, per_row))
    block_b = int(min(block_b, B))
    # Guarantee >= 2 grid steps so the "parallel" batch axis can actually split
    # across v7x's two TensorCores (no-op for tiny B).
    if B >= 16:
        block_b = min(block_b, pl.cdiv(B, 2))
    # Multi-step tiles must be sublane-aligned (a full-B single block is always
    # legal because it equals the array dim).
    if block_b < B:
        block_b = max(8, (block_b // 8) * 8)
        block_b = min(block_b, B)
    return block_b


def senet_layer(inputs, w1, w2, *, block_b=None):
    """SENETLayer forward.

    inputs: (B, field_size, embedding_size) float32
    w1:     nn.Linear(field_size, reduction_size, bias=False).weight -> (R, F)
    w2:     nn.Linear(reduction_size, field_size, bias=False).weight -> (F, R)
    returns (B, field_size, embedding_size)
    """
    if inputs.ndim != 3:
        raise ValueError(
            "Unexpected inputs dimensions %d, expect to be 3 dimensions" % inputs.ndim)

    B, F, E = inputs.shape
    R = w1.shape[0]
    FE = F * E

    # Fold the mean-over-E squeeze (and its 1/E scale) into W1, and the
    # per-field gate broadcast into W2 — exact, done once in the wrapper.
    w1_eff = jnp.repeat(jnp.transpose(w1), E, axis=0) * (1.0 / E)   # (F*E, R)
    w2_eff = jnp.repeat(jnp.transpose(w2), E, axis=1)               # (R, F*E)

    # Free row-major view: lane-dense streaming layout.
    x2d = inputs.reshape(B, FE)

    vmem_limit = _pick_vmem_limit_bytes()
    block_b = _choose_block_b(B, FE, inputs.dtype.itemsize, vmem_limit, block_b)
    grid = (pl.cdiv(B, block_b),)

    out2d = pl.pallas_call(
        _senet_kernel,
        out_shape=jax.ShapeDtypeStruct((B, FE), inputs.dtype),
        grid_spec=pltpu.PrefetchScalarGridSpec(
            num_scalar_prefetch=0,
            grid=grid,
            in_specs=[
                pl.BlockSpec((block_b, FE), lambda i: (i, 0)),
                pl.BlockSpec((FE, R), lambda i: (0, 0)),   # resident folded weights
                pl.BlockSpec((R, FE), lambda i: (0, 0)),
            ],
            out_specs=pl.BlockSpec((block_b, FE), lambda i: (i, 0)),
        ),
        compiler_params=pltpu.CompilerParams(
            dimension_semantics=("parallel",),   # batch axis: shard across TCs (v7x)
            vmem_limit_bytes=vmem_limit,
        ),
    )(x2d, w1_eff, w2_eff)

    return out2d.reshape(B, F, E)


def _reference(x, w1, w2):
    """Pure-JAX replica of the PyTorch forward."""
    z = jnp.mean(x, axis=-1)                       # (B, F)
    a = jax.nn.relu(z @ w1.T)                      # (B, R)
    a = jax.nn.relu(a @ w2.T)                      # (B, F)
    return x * a[:, :, None]                       # (B, F, E)


if __name__ == "__main__":
    # Small shapes consistent with (batch, field_size, embedding_size).
    B, FIELD, EMB = 16, 12, 32
    REDUCTION_RATIO = 3
    RED = max(1, FIELD // REDUCTION_RATIO)         # reduction_size = 4

    key = jax.random.PRNGKey(0)
    kx, k1, k2 = jax.random.split(key, 3)

    x = jax.random.normal(kx, (B, FIELD, EMB), dtype=jnp.float32)
    # nn.Linear weights: (out_features, in_features), bias=False.
    w1 = 0.1 * jax.random.normal(k1, (RED, FIELD), dtype=jnp.float32)
    w2 = 0.1 * jax.random.normal(k2, (FIELD, RED), dtype=jnp.float32)

    # Default sizing gives block_b=8 -> grid=(2,), exercising the multi-step
    # pipeline and the v7x parallel split.
    out = senet_layer(x, w1, w2)
    out = jax.block_until_ready(out)

    ref = _reference(x, w1, w2)
    assert out.shape == (B, FIELD, EMB)
    max_diff = float(jnp.max(jnp.abs(out - ref)))
    assert jnp.allclose(out, ref, atol=2e-5, rtol=2e-5), (
        "mismatch vs reference, max abs diff = %e" % max_diff)

    print("KERNEL_OK")
</pallas_src>

<mosaic_0001>
module attributes {stable_mosaic.version = 11 : i64} {
  func.func @_senet_kernel(%arg0: i32, %arg1: memref<8x384xf32, #tpu.memory_space<vmem>>, %arg2: memref<384x4xf32, #tpu.memory_space<vmem>>, %arg3: memref<4x384xf32, #tpu.memory_space<vmem>>, %arg4: memref<8x384xf32, #tpu.memory_space<vmem>>) attributes {dimension_semantics = [#tpu.dimension_semantics<parallel>], iteration_bounds = array<i64: 2>, scalar_prefetch = 0 : i64, scratch_operands = 0 : i64, tpu.core_type = #tpu.core_type<tc>, window_params = [{transform_indices = @transform_0, window_bounds = array<i64: 8, 384>}, {pipeline_mode = #tpu.pipeline_mode<synchronous>, transform_indices = @transform_1, window_bounds = array<i64: 384, 4>}, {pipeline_mode = #tpu.pipeline_mode<synchronous>, transform_indices = @transform_2, window_bounds = array<i64: 4, 384>}, {transform_indices = @transform_3, window_bounds = array<i64: 8, 384>}]} {
    %c0 = arith.constant 0 : index
    %c0_0 = arith.constant 0 : index
    %0 = vector.load %arg1[%c0, %c0_0] : memref<8x384xf32, #tpu.memory_space<vmem>>, vector<8x384xf32>
    %c0_1 = arith.constant 0 : index
    %c0_2 = arith.constant 0 : index
    %1 = vector.load %arg2[%c0_1, %c0_2] : memref<384x4xf32, #tpu.memory_space<vmem>>, vector<384x4xf32>
    %cst = arith.constant dense<0.000000e+00> : vector<8x4xf32>
    %2 = tpu.matmul %0, %1, %cst {dimension_numbers = #tpu.dot_dimension_numbers<[1], [0], [0], [1], [0, 0, 1, 1], [], []>} : vector<8x384xf32>, vector<384x4xf32>, vector<8x4xf32> -> vector<8x4xf32>
    %cst_3 = arith.constant 0.000000e+00 : f32
    %3 = vector.broadcast %cst_3 : f32 to vector<8x4xf32>
    %4 = arith.maximumf %2, %3 : vector<8x4xf32>
    %c0_4 = arith.constant 0 : index
    %c0_5 = arith.constant 0 : index
    %5 = vector.load %arg3[%c0_4, %c0_5] : memref<4x384xf32, #tpu.memory_space<vmem>>, vector<4x384xf32>
    %cst_6 = arith.constant dense<0.000000e+00> : vector<8x384xf32>
    %6 = tpu.matmul %4, %5, %cst_6 {dimension_numbers = #tpu.dot_dimension_numbers<[1], [0], [0], [1], [0, 0, 1, 1], [], []>} : vector<8x4xf32>, vector<4x384xf32>, vector<8x384xf32> -> vector<8x384xf32>
    %cst_7 = arith.constant 0.000000e+00 : f32
    %7 = vector.broadcast %cst_7 : f32 to vector<8x384xf32>
    %8 = arith.maximumf %6, %7 : vector<8x384xf32>
    %9 = arith.mulf %0, %8 : vector<8x384xf32>
    %c0_8 = arith.constant 0 : index
    %c0_9 = arith.constant 0 : index
    %10 = vector.load %arg4[%c0_8, %c0_9] : memref<8x384xf32, #tpu.memory_space<vmem>>, vector<8x384xf32>
    tpu.vector_store %arg4[%c0_8, %c0_9], %9 {strides = array<i32>} : memref<8x384xf32, #tpu.memory_space<vmem>>, vector<8x384xf32>,
    return
  }
  func.func @transform_0(%arg0: i32) -> (i32, i32) {
    %c0_i32 = arith.constant 0 : i32
    %c0_i32_0 = arith.constant 0 : i32
    return %arg0, %c0_i32 : i32, i32
  }
  func.func @transform_1(%arg0: i32) -> (i32, i32) {
    %c0_i32 = arith.constant 0 : i32
    %c0_i32_0 = arith.constant 0 : i32
    %c0_i32_1 = arith.constant 0 : i32
    return %c0_i32, %c0_i32_0 : i32, i32
  }
  func.func @transform_2(%arg0: i32) -> (i32, i32) {
    %c0_i32 = arith.constant 0 : i32
    %c0_i32_0 = arith.constant 0 : i32
    %c0_i32_1 = arith.constant 0 : i32
    return %c0_i32, %c0_i32_0 : i32, i32
  }
  func.func @transform_3(%arg0: i32) -> (i32, i32) {
    %c0_i32 = arith.constant 0 : i32
    %c0_i32_0 = arith.constant 0 : i32
    return %arg0, %c0_i32 : i32, i32
  }
}

</mosaic_0001>

<bundles_post_ra>
// kernel: tpu_custom_call.1
= control target key start
LH: loop header
LB: loop body
LE: loop exit
PB: predicated region body
PF: predicated region fallthrough
CT: control target
= control target key end

     0   :  { %8 = vsyncpa [#allocation3], 0  ;;  %s1176_s0 = inlined_call_operand.vmem [shape: f32[16,384], index: 0, kind: input, shape index: {}]   ;;  %s1177_s1 = inlined_call_operand.vmem [shape: f32[384,4], index: 1, kind: input, shape index: {}]   ;;  %s1178_s2 = inlined_call_operand.vmem [shape: f32[4,384], index: 2, kind: input, shape index: {}]   ;;  %s1179_s3 = inlined_call_operand.hbm [shape: f32[16,384], index: 3, kind: output, shape index: {}]  }
   0x1   :  { %10 = vsyncpa [#allocation3 + $0x1], 0  ;;  %s898_s12 = smov 0   ;;  %s900_s13 = smov 0  }
   0x2   :  { %s902_s14 = smov 0   ;;  %s904_s15 = smov 0  }
   0x3 LB: > { %s919_s16 = sadd.s32 4294967295, %s872_s15   ;;  %s601_s17 = sadd.s32 4294967294, %s872_s15   ;;  %s872_s15 = sphi %s904_s15, %s1185_s15   ;;  %s868_s14 = sphi %s902_s14, %s1184_s14   ;;  %s864_s13 = sphi %s900_s13, %s1183_s13   ;;  %s860_s12 = sphi %s898_s12, %s1182_s12  }
   0x4   : > { %s923_s18 = sadd.s32 1, %s872_s15   ;;  %s91_s19 = sadd.s32 1, %s868_s14 }
   0x5   : > { %s88_s20 = ssub.s32 %s872_s15, %s923_s18  ;;  %p101_p0 = scmp.ne.s32.totalorder %s868_s14, %s864_s13 }
   0x6   : > { %p89_p1 = scmp.eq.s32.totalorder %s88_s20, 0  ;;  %p102_p2 = scmp.eq.s32.totalorder %s919_s16, 1 }
   0x7   : > { %p107_p3 = scmp.ne.s32.totalorder %s864_s13, %s860_s12  ;;  %p108_p4 = scmp.eq.s32.totalorder %s601_s17, 1 }
   0x8   : > { %s934_s21 = scalar_select %p89_p1, %s868_s14, %s91_s19  }
   0x9   : > { %p936_p5 = por %p102_p2, %p101_p0  ;;  %p940_p6 = por %p108_p4, %p107_p3 }
   0xa   : > { %p604_p7 = scmp.ge.s32.totalorder %s872_s15, 1  ;;  %p140_p8 = scmp.lt.s32.totalorder %s872_s15, 3 }
   0xc   : > { %p141_p9 = pnand %p604_p7, %p140_p8 }
   0xd   : > { %v188_v0 = vld [vmem:[%s1177_s1 + $0x80] sm:$0xff] (!%p141_p9)  ;;  %v189_v1 = vld [vmem:[%s1177_s1 + $0x88] sm:$0xff] (!%p141_p9)  ;;  %p164_p10 = scmp.lt.s32.totalorder (!%p141_p9), %s919_s16, 1  ;;  %v874_v5 = vmov (!%p141_p9), 0.0|0.0   ;;  %v190_v10 = vld [vmem:[%s1177_s1 + $0x90] sm:$0xff] (!%p141_p9)  ;;  %vm875_vm0 = vmmov (!%p141_p9), 0  }
   0xe   : > { %144 = sbr.rel (%p141_p9) target bundleno = 498 (0x1f2), region = 32  ;;  %v172_v2 = vld [vmem:[%s1177_s1] sm:$0xff] (!%p141_p9)  ;;  %v708_v3 = vpack.c.bf16 (!%p141_p9), %v189_v1, %v188_v0  ;;  %v173_v4 = vld [vmem:[%s1177_s1 + $0x8] sm:$0xff] (!%p141_p9)  ;;  %740 = vmatprep.subr.bf16.mxu1 (!%p141_p9), %v874_v5  ;;  %v191_v11 = vld [vmem:[%s1177_s1 + $0x98] sm:$0xff] (!%p141_p9)  ;;  %v876_v13 = vmov (!%p141_p9), 0.0   ;;  %vm370_vm1 = vcmask (!%p141_p9), 1043456  }
   0xf   : > { %v204_v6 = vld [vmem:[%s1177_s1 + $0x100] sm:$0xff] (!%p141_p9)  ;;  %v205_v7 = vld [vmem:[%s1177_s1 + $0x108] sm:$0xff] (!%p141_p9)  ;;  %v710_v8 = vpack.c.bf16 (!%p141_p9), %v173_v4, %v172_v2  ;;  %v174_v12 = vld [vmem:[%s1177_s1 + $0x10] sm:$0xff] (!%p141_p9)  ;;  %700 = vmatprep.mubr.msk.f32.mxu1 (!%p141_p9), %vm875_vm0, %v876_v13  ;;  %v712_v14 = vpack.c.bf16 (!%p141_p9), %v191_v11, %v190_v10  ;;  %vm366_vm2 = vcmask (!%p141_p9), 31744   ;;  %s766_s24 = smul.u32 (!%p141_p9), 384, %s919_s16  ;;  %s877_s6 = smov (!%p141_p9), [#allocation2]  }
  0x10   : > { %v741_v9 = vpack.c.bf16 (!%p141_p9), %v205_v7, %v204_v6  ;;  %709 = vmatprep.subr.bf16.mxu0 (!%p141_p9), %v708_v3  ;;  %v175_v15 = vld [vmem:[%s1177_s1 + $0x18] sm:$0xff] (!%p141_p9)  ;;  %v206_v16 = vld [vmem:[%s1177_s1 + $0x110] sm:$0xff] (!%p141_p9)  ;;  %v192_v20 = vld [vmem:[%s1177_s1 + $0xa0] sm:$0xff] (!%p141_p9)  ;;  %s814_s7 = sshll.u32 (!%p141_p9), %s877_s6, 4  ;;  %s815_s7 = int_to_ptr.vmem [resolvable:$false] %s814_s7 }
  0x11   : > { %v207_v17 = vld [vmem:[%s1177_s1 + $0x118] sm:$0xff] (!%p141_p9)  ;;  %711 = vmatpush3.bf16.msra.mxu0 (!%p141_p9), %v710_v8  ;;  %v714_v18 = vpack.c.bf16 (!%p141_p9), %v175_v15, %v174_v12  ;;  %v193_v21 = vld [vmem:[%s1177_s1 + $0xa8] sm:$0xff] (!%p141_p9)  ;;  %v176_v22 = vld [vmem:[%s1177_s1 + $0x20] sm:$0xff] (!%p141_p9)  ;;  %s1134_s30 = scalar_lea.hbm (!%p141_p9), %s1179_s3, %s766_s24  ;;  %s816_s8 = scalar_lea.vmem (!%p141_p9), %s815_s7, 768 }
  0x12   : > { %742 = vmatpush3.bf16.msra.mxu1 (!%p141_p9), %v741_v9  ;;  %v744_v19 = vpack.c.bf16 (!%p141_p9), %v207_v17, %v206_v16  ;;  %713 = vmatprep.subr.bf16.mxu0 (!%p141_p9), %v712_v14  ;;  %v716_v23 = vpack.c.bf16 (!%p141_p9), %v193_v21, %v192_v20  ;;  %v177_v24 = vld [vmem:[%s1177_s1 + $0x28] sm:$0xff] (!%p141_p9)  ;;  %v208_v25 = vld [vmem:[%s1177_s1 + $0x120] sm:$0xff] (!%p141_p9)  ;;  %v194_v27 = vld [vmem:[%s1177_s1 + $0xb0] sm:$0xff] (!%p141_p9) }
  0x13   : > { %743 = vmatprep.subr.bf16.mxu1 (!%p141_p9), %v874_v5  ;;  %v209_v26 = vld [vmem:[%s1177_s1 + $0x128] sm:$0xff] (!%p141_p9)  ;;  %v195_v28 = vld [vmem:[%s1177_s1 + $0xb8] sm:$0xff] (!%p141_p9)  ;;  %v718_v29 = vpack.c.bf16 (!%p141_p9), %v177_v24, %v176_v22  ;;  %v178_v31 = vld [vmem:[%s1177_s1 + $0x30] sm:$0xff] (!%p141_p9) }
  0x14   : > { %v747_v30 = vpack.c.bf16 (!%p141_p9), %v209_v26, %v208_v25  ;;  %v720_v32 = vpack.c.bf16 (!%p141_p9), %v195_v28, %v194_v27  ;;  %v179_v33 = vld [vmem:[%s1177_s1 + $0x38] sm:$0xff] (!%p141_p9)  ;;  %v210_v34 = vld [vmem:[%s1177_s1 + $0x130] sm:$0xff] (!%p141_p9)  ;;  %v196_v36 = vld [vmem:[%s1177_s1 + $0xc0] sm:$0xff] (!%p141_p9) }
  0x15   : > { %s998_s9 = scalar_select %p164_p10, %s919_s16, 1  ;;  %715 = vmatpush3.bf16.msra.mxu0 %v714_v18  ;;  %v211_v35 = vld [vmem:[%s1177_s1 + $0x138] sm:$0xff]  ;;  %v197_v37 = vld [vmem:[%s1177_s1 + $0xc8] sm:$0xff]  ;;  %v722_v38 = vpack.c.bf16 %v179_v33, %v178_v31  ;;  %v180_v40 = vld [vmem:[%s1177_s1 + $0x40] sm:$0xff] }
  0x16   : > { %745 = vmatpush3.bf16.msra.mxu1 %v744_v19  ;;  %717 = vmatprep.subr.bf16.mxu0 %v716_v23  ;;  %v750_v39 = vpack.c.bf16 %v211_v35, %v210_v34  ;;  %v724_v41 = vpack.c.bf16 %v197_v37, %v196_v36  ;;  %v181_v42 = vld [vmem:[%s1177_s1 + $0x48] sm:$0xff]  ;;  %v212_v43 = vld [vmem:[%s1177_s1 + $0x140] sm:$0xff]  ;;  %v198_v45 = vld [vmem:[%s1177_s1 + $0xd0] sm:$0xff] }
  0x17   : > { %s765_s4 = smul.u32 24, %s998_s9  ;;  %746 = vmatprep.subr.bf16.mxu1 %v874_v5  ;;  %v213_v44 = vld [vmem:[%s1177_s1 + $0x148] sm:$0xff]  ;;  %v199_v46 = vld [vmem:[%s1177_s1 + $0xd8] sm:$0xff]  ;;  %v726_v48 = vpack.c.bf16 %v181_v42, %v180_v40  ;;  %v182_v50 = vld [vmem:[%s1177_s1 + $0x50] sm:$0xff] }
  0x18   : > { %v753_v49 = vpack.c.bf16 %v213_v44, %v212_v43  ;;  %v728_v51 = vpack.c.bf16 %v199_v46, %v198_v45  ;;  %v183_v52 = vld [vmem:[%s1177_s1 + $0x58] sm:$0xff]  ;;  %v214_v53 = vld [vmem:[%s1177_s1 + $0x150] sm:$0xff]  ;;  %v200_v55 = vld [vmem:[%s1177_s1 + $0xe0] sm:$0xff] }
  0x19   : > { %719 = vmatpush3.bf16.msra.mxu0 %v718_v29  ;;  %s1042_s28 = scalar_lea.vmem %s1176_s0, %s765_s4  ;;  %v215_v54 = vld [vmem:[%s1177_s1 + $0x158] sm:$0xff]  ;;  %v201_v56 = vld [vmem:[%s1177_s1 + $0xe8] sm:$0xff]  ;;  %v730_v57 = vpack.c.bf16 %v183_v52, %v182_v50  ;;  %v184_v59 = vld [vmem:[%s1177_s1 + $0x60] sm:$0xff] }
  0x1a   : > { %748 = vmatpush3.bf16.msra.mxu1 %v747_v30  ;;  %721 = vmatprep.subr.bf16.mxu0 %v720_v32  ;;  %v1061_v47 = vld [vmem:[%s1042_s28 + $0x8] sm:$0xff]  ;;  %v756_v58 = vpack.c.bf16 %v215_v54, %v214_v53  ;;  %v732_v60 = vpack.c.bf16 %v201_v56, %v200_v55  ;;  %v216_v62 = vld [vmem:[%s1177_s1 + $0x160] sm:$0xff]  ;;  %v202_v0 = vld [vmem:[%s1177_s1 + $0xf0] sm:$0xff] }
  0x1b   : > { %749 = vmatprep.subr.bf16.mxu1 %v874_v5  ;;  %284 = vmatprep.mubr.f32.mxu0 %v1061_v47  ;;  %v185_v61 = vld [vmem:[%s1177_s1 + $0x68] sm:$0xff]  ;;  %v203_v1 = vld [vmem:[%s1177_s1 + $0xf8] sm:$0xff]  ;;  %v186_v4 = vld [vmem:[%s1177_s1 + $0x70] sm:$0xff] }
  0x1c   : > { %v217_v63 = vld [vmem:[%s1177_s1 + $0x168] sm:$0xff]  ;;  %v734_v2 = vpack.c.bf16 %v185_v61, %v184_v59  ;;  %v736_v6 = vpack.c.bf16 %v203_v1, %v202_v0  ;;  %v187_v7 = vld [vmem:[%s1177_s1 + $0x78] sm:$0xff]  ;;  %v218_v8 = vld [vmem:[%s1177_s1 + $0x170] sm:$0xff] }
  0x1d   : > { %723 = vmatpush3.bf16.msra.mxu0 %v722_v38  ;;  %v759_v3 = vpack.c.bf16 %v217_v63, %v216_v62  ;;  %v219_v9 = vld [vmem:[%s1177_s1 + $0x178] sm:$0xff]  ;;  %v738_v10 = vpack.c.bf16 %v187_v7, %v186_v4  ;;  %v169_v12 = vld [vmem:[%s1042_s28] sm:$0xff]  ;;  %v171_v14 = vld [vmem:[%s1042_s28 + $0x10] sm:$0xff]  ;;  %s161_s28 = sand.u32 1, %s864_s13  }
  0x1e   : > { %751 = vmatpush3.bf16.msra.mxu1 %v750_v39  ;;  %725 = vmatprep.subr.bf16.mxu0 %v724_v41  ;;  %v762_v11 = vpack.c.bf16 %v219_v9, %v218_v8  ;;  %v361_v15 = vld [vmem:[%s1178_s2] sm:$0xff]  ;;  %s764_s20 = smul.u32 24, %s161_s28  ;;  %s528_s16 = scalar_lea.sflag [#allocation3], %s161_s28 }
  0x1f   : > { %752 = vmatprep.subr.bf16.mxu1 %v874_v5  ;;  %v365_v16 = vcombine.high %v361_v15, %v361_v15 }
  0x20   : > { %s163_s25 = scalar_lea.vmem [#allocation2], %s764_s20 }
  0x21   : > { %727 = vmatpush3.bf16.msra.mxu0 %v726_v48  ;;  %s542_s26 = sshll.u32 %s163_s25, 4  ;;  %s1136_s26 = int_to_ptr.vmem [resolvable:$true] %s542_s26 }
  0x22   : > { %754 = vmatpush3.bf16.msra.mxu1 %v753_v49  ;;  %729 = vmatprep.subr.bf16.mxu0 %v728_v51  ;;  %s810_s5 = scalar_lea.vmem %s1136_s26, 384  ;;  %p817_p0 = scmp.lt.s32.totalorder %s1136_s26, %s815_s7 }
  0x23   : > { %755 = vmatprep.subr.bf16.mxu1 %v874_v5  ;;  %p811_p11 = scmp.ne.s32.totalorder %s1136_s26, %s810_s5  ;;  %p818_p1 = scmp.lt.s32.totalorder %s816_s8, %s810_s5 }
  0x25   : > { %731 = vmatpush3.bf16.msra.mxu0 %v730_v57  ;;  %p812_p12 = pnand %p811_p11, %p936_p5  ;;  %p819_p2 = por %p818_p1, %p817_p0 }
  0x26   : > { %757 = vmatpush3.bf16.msra.mxu1 %v756_v58  ;;  %733 = vmatprep.subr.bf16.mxu0 %v732_v60 }
  0x27   : > { %758 = vmatprep.subr.bf16.mxu1 %v874_v5  ;;  %p813_p13 = pneg %p812_p12 }
  0x29   : > { %735 = vmatpush3.bf16.msra.mxu0 %v734_v2  ;;  %p820_p3 = pnand %p819_p2, %p813_p13 }
  0x2a   : > { %760 = vmatpush3.bf16.msra.mxu1 %v759_v3  ;;  %737 = vmatprep.subr.bf16.mxu0 %v736_v6 }
  0x2b   : > { %761 = vmatprep.subr.bf16.mxu1 %v874_v5  ;;  %v362_v5 = vld [vmem:[%s1178_s2 + $0x8] sm:$0xf] }
  0x2d   : > { %739 = vmatpush3.bf16.msra.mxu0 %v738_v10 }
  0x2e   : > { %763 = vmatpush3.bf16.msra.mxu1 %v762_v11  ;;  %606 = vmatprep.subr.msk.mxu0 %vm370_vm1, %v365_v16 }
  0x2f   : > { %703 = vmatprep.subr.mxu1 %v876_v13 }
  0x30   : > { %285 = vmatmul.mubr.f32.vlgmr.msra.gmra.mrb[0].mxu0 %v169_v12 }
  0x31   : > { %701 = vmatmul.mubr.f32.vlgmr.msra.gmra.mrb[0].mxu1 %v171_v14  ;;  %441 = vmatprep.mubr.f32.mxu0 %v876_v13 }
  0x32   : > { %705 = vmatprep.mubr.msk.f32.mxu1 %vm875_vm0, %v876_v13  ;;  %607 = vmatpush1.msk.msra.mxu0 %vm370_vm1, %v361_v15 }
  0x33   : > { %704 = vmatpush3.msk.msra.mxu1 %vm370_vm1, %v362_v5 }
 0x103   : > { %v646_v17 = vpop.f32.mrb[0].mxu0 }
 0x104   : > { %v356_v18 = vpop.f32.mrb[0].mxu1  ;;  %v647_v19 = vpop.f32.mrb[1].mxu0 }
 0x105   : > { %v702_v20 = vpop.f32.mrb[1].mxu1  ;;  %v648_v13 = vadd.f32 %v647_v19, %v646_v17 }
 0x107   : > { %v357_v21 = vadd.f32 %v648_v13, %v356_v18 }
 0x109   : > { %v360_v22 = vmax.f32 %v357_v21, 0.0 }
 0x10b   : > { %608 = vmatmul.mubr.msk.f32.vlgmr.msra.gmra.mrb[2].mxu0 %vm366_vm2, %v360_v22  ;;  %706 = vmatmul.mubr.msk.f32.vlgmr.msra.gmra.mrb[2].mxu1 %vm366_vm2, %v360_v22 }
 0x1de   : > { %v443_v23 = vpop.f32.mrb[2].mxu0  ;;  %v514_v24 = vpop.f32.mrb[2].mxu1 }
 0x1df   : > { %v518_v25 = vmax.f32 %v443_v23, 0.0  ;;  %v520_v26 = vmax.f32 %v514_v24, 0.0  ;;  %v445_v27 = vpop.f32.mrb[3].mxu0  ;;  %v707_v28 = vpop.f32.mrb[3].mxu1 }
 0x1e0   : > { %v519_v29 = vmax.f32 %v445_v27, 0.0 }
 0x1e1   : > { %v521_v30 = vmul.f32 %v518_v25, %v169_v12  ;;  %v523_v31 = vmul.f32 %v520_v26, %v171_v14 }
 0x1e2   : > { %v522_v32 = vmul.f32 %v519_v29, %v1061_v47 }
 0x1e3   : > { %524 = vst [vmem:[%s163_s25] sm:$0xff] %v521_v30  ;;  %526 = vst [vmem:[%s163_s25 + $0x10] sm:$0xff] %v523_v31 }
 0x1e4   : > { %525 = vst [vmem:[%s163_s25 + $0x8] sm:$0xff] %v522_v32 }
 0x1e5   : > { %823 = shalt.err (!%p820_p3)
}
 0x1e6   : > { %s824_s10 = scalar_lea.hbm %s1134_s30, 384  ;;  %s828_s17 = scalar_lea.hbm %s1179_s3, 768 }
 0x1e7   : > { %p825_p4 = scmp.ne.s32.totalorder %s1134_s30, %s824_s10  ;;  %p829_p9 = scmp.lt.u32.totalorder %s1134_s30, %s1179_s3 }
 0x1e8   : > { %p830_p10 = scmp.lt.u32.totalorder %s828_s17, %s824_s10  ;;  %p832_p12 = scmp.lt.u32.totalorder %s824_s10, %s1134_s30 }
 0x1e9   : > { %p826_p7 = pnand %p825_p4, %p936_p5 }
 0x1ea   : > { %p831_p11 = por %p830_p10, %p829_p9 }
 0x1eb   : > { %p827_p8 = pneg %p826_p7 }
 0x1ec   : > { %p833_p13 = por %p832_p12, %p831_p11 }
 0x1ee   : > { %p834_p0 = pnand %p833_p13, %p827_p8 }
 0x1f0   : > { %837 = shalt.err (!%p834_p0)
}
 0x1f1   : > { %767 = dma.vmem_to_hbm [thread:$0]  (%p936_p5), %s1136_s26, 384, %s1134_s30, %s528_s16  }
 0x1f2 PF: > { %p773_p1 = scmp.ge.s32.totalorder %s872_s15, 2  ;;  %s554_s28 = sand.u32 1, %s860_s12  }
 0x1f3   : > { %s555_s20 = scalar_lea.sflag [#allocation3], %s554_s28 }
 0x1f4   : > { %p770_p2 = pnand %p773_p1, %p940_p6 }
 0x1f6   : > { %855 = dma.done.wait (!%p770_p2), %s555_s20, 384  }
 0x1f7   : > { %857 = vsyncadd (!%p770_p2), %s555_s20, 4294966912  ;;  %p13_p3 = scmp.ge.s32.totalorder %s923_s18, 4   ;;  %s1182_s12 = smov %s864_s13 }
 0x1f8   : > { %s1183_s13 = smov %s868_s14  ;;  %s1184_s14 = smov %s934_s21 }
 0x1f9   : > { %s1185_s15 = smov %s923_s18  ;;  %15 = sbr.rel (!%p13_p3) target bundleno = 3 (0x3), region = 67 }
 0x200   :  { %560 = vsyncpa [#allocation3], 1 }
 0x201   :  { %562 = vsyncpa [#allocation3 + $0x1], 1 }

</bundles_post_ra>
